<compile_context>
chip_gen: v7x
topology: tpu7x:2x2x1
jax: 0.10.0
libtpu: 0.0.40
codegen_flags: <defaults>
</compile_context>

<pallas_src>
import jax
import jax.numpy as jnp
from jax.experimental import pallas as pl
from jax.experimental.pallas import tpu as pltpu

_LANES = 128
_MIN_GRID_STEPS = 4          # keep a few grid steps so v7x megacore gets work
_MAX_BLOCK_BYTES = 8 * 1024 * 1024


def _residue_gate_kernel(x_ref, y_ref, o_ref):
    # Elementwise add on the whole VMEM tile (VPU); fully hidden under DMA.
    o_ref[...] = x_ref[...] + y_ref[...]


def _round_up(a, b):
    return -(-a // b) * b


def _vmem_capacity_bytes():
    try:
        return int(pltpu.get_tpu_info().vmem_capacity_bytes)
    except Exception:
        # Conservative fallback (v7x per-TC VMEM).
        return 64 * 1024 * 1024


def _add_2d(xf, yf, *, tile_rows, vmem_limit_bytes, aliases):
    """Add two (rows, 128) arrays with a tiled Pallas kernel."""
    rows = xf.shape[0]
    itemsize = jnp.dtype(xf.dtype).itemsize
    n = xf.size
    grid = (pl.cdiv(rows, tile_rows),)   # ragged last block is clipped by Pallas
    return pl.pallas_call(
        _residue_gate_kernel,
        out_shape=jax.ShapeDtypeStruct((rows, _LANES), xf.dtype),
        grid=grid,
        in_specs=[
            pl.BlockSpec((tile_rows, _LANES), lambda i: (i, 0)),
            pl.BlockSpec((tile_rows, _LANES), lambda i: (i, 0)),
        ],
        out_specs=pl.BlockSpec((tile_rows, _LANES), lambda i: (i, 0)),
        compiler_params=pltpu.CompilerParams(
            dimension_semantics=("parallel",),
            vmem_limit_bytes=vmem_limit_bytes,
        ),
        cost_estimate=pl.CostEstimate(
            flops=n, transcendentals=0, bytes_accessed=3 * n * itemsize,
        ),
        input_output_aliases=aliases,
    )(xf, yf)


def residue_gate(x, y, *, donate_x=False):
    """Compute x + y with a Pallas TPU kernel. x, y: same shape/dtype."""
    assert x.shape == y.shape and x.dtype == y.dtype
    orig_shape = x.shape
    n = x.size
    itemsize = jnp.dtype(x.dtype).itemsize

    # Minimum sublane pack depends on dtype width: 8 (f32), 16 (bf16), 32 (i8).
    sublane = max(8, 32 // itemsize)

    # Tiny tensors (< one vreg tile): not worth a kernel launch.
    if n < sublane * _LANES:
        return x + y

    # --- Generation-aware block sizing -------------------------------------
    vmem_bytes = _vmem_capacity_bytes()
    target_block_bytes = min(_MAX_BLOCK_BYTES, vmem_bytes // 16)

    n_main = (n // _LANES) * _LANES      # 128-aligned prefix handled by kernel
    rows = n_main // _LANES
    rows_aligned = _round_up(rows, sublane)

    target_rows = max(
        sublane,
        (target_block_bytes // (_LANES * itemsize)) // sublane * sublane,
    )
    # Cap the tile so the grid keeps >= _MIN_GRID_STEPS steps (v7x: 2 TCs).
    cap_rows = max(sublane, _round_up(pl.cdiv(rows, _MIN_GRID_STEPS), sublane))
    tile_rows = min(target_rows, cap_rows, rows_aligned)

    block_bytes = tile_rows * _LANES * itemsize
    # 3 arrays x 2 pipeline buffers x block + margin, clamped to physical VMEM.
    vmem_limit = int(min(vmem_bytes * 3 // 4, 6 * block_bytes + 4 * 1024 * 1024))
    vmem_limit = max(vmem_limit, 16 * 1024 * 1024)

    if n_main == n:
        # Fast path: contiguous reshape is free, no padding, no extra passes.
        xf = x.reshape(rows, _LANES)
        yf = y.reshape(rows, _LANES)
        aliases = {0: 0} if donate_x else {}
        out = _add_2d(
            xf, yf, tile_rows=tile_rows, vmem_limit_bytes=vmem_limit,
            aliases=aliases,
        )
        return out.reshape(orig_shape)

    # Ragged path: kernel on the 128-aligned prefix, plain XLA add on the
    # <=127-element tail (negligible), then stitch back together.
    xflat = x.reshape(-1)
    yflat = y.reshape(-1)
    main = _add_2d(
        xflat[:n_main].reshape(rows, _LANES),
        yflat[:n_main].reshape(rows, _LANES),
        tile_rows=tile_rows, vmem_limit_bytes=vmem_limit, aliases={},
    )
    tail = xflat[n_main:] + yflat[n_main:]
    return jnp.concatenate([main.reshape(-1), tail]).reshape(orig_shape)


if __name__ == "__main__":
    key = jax.random.PRNGKey(0)
    kx, ky = jax.random.split(key)

    # NCHW inputs matching the PyTorch module's typical usage (fast path).
    x = jax.random.normal(kx, (2, 4, 16, 16), dtype=jnp.float32)
    y = jax.random.normal(ky, (2, 4, 16, 16), dtype=jnp.float32)
    out = residue_gate(x, y)
    jax.block_until_ready(out)
    ref = x + y
    assert out.shape == ref.shape and out.dtype == ref.dtype
    assert jnp.allclose(out, ref, atol=1e-6, rtol=1e-6)

    # Exercise the ragged (n % 128 != 0) prefix + tail path as well.
    kx2, ky2 = jax.random.split(ky)
    x2 = jax.random.normal(kx2, (9, 200), dtype=jnp.float32)
    y2 = jax.random.normal(ky2, (9, 200), dtype=jnp.float32)
    out2 = residue_gate(x2, y2)
    jax.block_until_ready(out2)
    assert jnp.allclose(out2, x2 + y2, atol=1e-6, rtol=1e-6)

    print("KERNEL_OK")
</pallas_src>

<mosaic_0001>
module attributes {stable_mosaic.version = 11 : i64} {
  func.func @_residue_gate_kernel(%arg0: i32, %arg1: memref<8x128xf32, #tpu.memory_space<vmem>>, %arg2: memref<8x128xf32, #tpu.memory_space<vmem>>, %arg3: memref<8x128xf32, #tpu.memory_space<vmem>>) attributes {dimension_semantics = [#tpu.dimension_semantics<parallel>], iteration_bounds = array<i64: 2>, scalar_prefetch = 0 : i64, scratch_operands = 0 : i64, tpu.core_type = #tpu.core_type<tc>, window_params = [{transform_indices = @transform_0, window_bounds = array<i64: 8, 128>}, {transform_indices = @transform_1, window_bounds = array<i64: 8, 128>}, {transform_indices = @transform_2, window_bounds = array<i64: 8, 128>}]} {
    %c0 = arith.constant 0 : index
    %c0_0 = arith.constant 0 : index
    %0 = vector.load %arg1[%c0, %c0_0] : memref<8x128xf32, #tpu.memory_space<vmem>>, vector<8x128xf32>
    %c0_1 = arith.constant 0 : index
    %c0_2 = arith.constant 0 : index
    %1 = vector.load %arg2[%c0_1, %c0_2] : memref<8x128xf32, #tpu.memory_space<vmem>>, vector<8x128xf32>
    %2 = arith.addf %0, %1 : vector<8x128xf32>
    %c0_3 = arith.constant 0 : index
    %c0_4 = arith.constant 0 : index
    %3 = vector.load %arg3[%c0_3, %c0_4] : memref<8x128xf32, #tpu.memory_space<vmem>>, vector<8x128xf32>
    tpu.vector_store %arg3[%c0_3, %c0_4], %2 {strides = array<i32>} : memref<8x128xf32, #tpu.memory_space<vmem>>, vector<8x128xf32>,
    return
  }
  func.func @transform_0(%arg0: i32) -> (i32, i32) {
    %c0_i32 = arith.constant 0 : i32
    %c0_i32_0 = arith.constant 0 : i32
    return %arg0, %c0_i32 : i32, i32
  }
  func.func @transform_1(%arg0: i32) -> (i32, i32) {
    %c0_i32 = arith.constant 0 : i32
    %c0_i32_0 = arith.constant 0 : i32
    return %arg0, %c0_i32 : i32, i32
  }
  func.func @transform_2(%arg0: i32) -> (i32, i32) {
    %c0_i32 = arith.constant 0 : i32
    %c0_i32_0 = arith.constant 0 : i32
    return %arg0, %c0_i32 : i32, i32
  }
}

</mosaic_0001>

<bundles_post_ra>
// kernel: tpu_custom_call.1
= control target key start
LH: loop header
LB: loop body
LE: loop exit
PB: predicated region body
PF: predicated region fallthrough
CT: control target
= control target key end

     0   :  { %7 = vsyncpa [#allocation3], 0  ;;  %s732_s0 = inlined_call_operand.hbm [shape: f32[16,128], index: 0, kind: input, shape index: {}]   ;;  %s733_s1 = inlined_call_operand.hbm [shape: f32[16,128], index: 1, kind: input, shape index: {}]   ;;  %s734_s2 = inlined_call_operand.hbm [shape: f32[16,128], index: 2, kind: output, shape index: {}]  }
   0x1   :  { %9 = vsyncpa [#allocation3 + $0x1], 0 }
   0x2   :  { %10 = vsyncpa [#allocation6], 0 }
   0x3   :  { %12 = vsyncpa [#allocation6 + $0x1], 0 }
   0x4   :  { %13 = vsyncpa [#allocation4], 0 }
   0x5   :  { %15 = vsyncpa [#allocation4 + $0x1], 0  ;;  %s523_s9 = smov 0   ;;  %s525_s10 = smov 0  }
   0x6   :  { %s527_s11 = smov 0   ;;  %s529_s12 = smov 0  }
   0x7 LB: > { %s544_s13 = sadd.s32 4294967295, %s503_s12   ;;  %s307_s14 = sadd.s32 4294967294, %s503_s12   ;;  %s503_s12 = sphi %s529_s12, %s753_s12   ;;  %s499_s11 = sphi %s527_s11, %s752_s11   ;;  %s495_s10 = sphi %s525_s10, %s751_s10   ;;  %s491_s9 = sphi %s523_s9, %s750_s9  }
   0x8   : > { %s548_s15 = sadd.s32 1, %s503_s12   ;;  %s28_s16 = sadd.s32 1, %s499_s11 }
   0x9   : > { %s25_s17 = ssub.s32 %s503_s12, %s548_s15  ;;  %p35_p0 = scmp.ne.s32.totalorder %s499_s11, %s495_s10 }
   0xa   : > { %p26_p1 = scmp.eq.s32.totalorder %s25_s17, 0  ;;  %p36_p2 = scmp.eq.s32.totalorder %s503_s12, 0 }
   0xb   : > { %p41_p3 = scmp.ne.s32.totalorder %s495_s10, %s491_s9  ;;  %p42_p4 = scmp.eq.s32.totalorder %s544_s13, 0 }
   0xc   : > { %s560_s18 = scalar_select %p26_p1, %s499_s11, %s28_s16  }
   0xd   : > { %p562_p5 = por %p36_p2, %p35_p0  ;;  %p566_p6 = por %p42_p4, %p41_p3 }
   0xe   : > { %p91_p7 = scmp.eq.s32.totalorder %s544_s13, 1  ;;  %p97_p8 = scmp.eq.s32.totalorder %s307_s14, 1 }
   0xf   : > { %s738_s20 = scalar_select %p566_p6, 1, 0 }
  0x10   : > { %p339_p10 = scmp.lt.s32.totalorder %s503_s12, 2  ;;  %p573_p11 = por %p91_p7, %p35_p0 }
  0x11   : > { %p577_p12 = por %p97_p8, %p41_p3  ;;  %s582_s23 = sand.u32 1, %s499_s11  }
  0x12   : > { %s739_s21 = scalar_select %p573_p11, 1, 0 }
  0x13   : > { %s740_s22 = scalar_select %p577_p12, 1, 0 }
  0x14   : > { %s311_s24 = sshll.u32 %s503_s12, 7  ;;  %s310_s25 = sshll.u32 %s582_s23, 3 }
  0x15   : > { %s591_s28 = scalar_lea.hbm %s732_s0, %s311_s24  ;;  %s121_s29 = scalar_lea.vmem [#allocation2], %s310_s25 }
  0x16   : > { %s128_s30 = sshll.u32 %s121_s29, 4  ;;  %p597_p13 = pnand %p339_p10, %p562_p5  ;;  %s601_s30 = int_to_ptr.vmem [resolvable:$true] %s128_s30 }
  0x17   : > { %s118_s4 = scalar_lea.sflag [#allocation3], %s582_s23  ;;  %s373_s5 = scalar_lea.hbm %s591_s28, 128 }
  0x18   : > { %p374_p2 = scmp.ne.s32.totalorder %s591_s28, %s373_s5  ;;  %p375_p3 = pneg %p597_p13 }
  0x19   : > { %s378_s8 = scalar_lea.hbm %s732_s0, 256  ;;  %p379_p5 = scmp.lt.u32.totalorder %s591_s28, %s732_s0 }
  0x1a   : > { %p376_p4 = pnand %p375_p3, %p374_p2  ;;  %p380_p8 = scmp.lt.u32.totalorder %s378_s8, %s373_s5 }
  0x1b   : > { %p382_p9 = scmp.lt.u32.totalorder %s373_s5, %s591_s28 }
  0x1c   : > { %p377_p7 = pneg %p376_p4  ;;  %p381_p10 = por %p380_p8, %p379_p5 }
  0x1e   : > { %p383_p0 = por %p382_p9, %p381_p10 }
  0x20   : > { %p384_p1 = pnand %p383_p0, %p377_p7 }
  0x22   : > { %387 = shalt.err (!%p384_p1)
}
  0x23   : > { %s388_s17 = scalar_lea.vmem %s601_s30, 128  ;;  %s505_s19 = smov [#allocation2]  }
  0x24   : > { %p389_p2 = scmp.ne.s32.totalorder %s601_s30, %s388_s17  ;;  %s393_s26 = sshll.u32 %s505_s19, 4  ;;  %s394_s26 = int_to_ptr.vmem [resolvable:$false] %s393_s26 }
  0x25   : > { %s395_s27 = scalar_lea.vmem %s394_s26, 256  ;;  %p396_p11 = scmp.lt.s32.totalorder %s601_s30, %s394_s26 }
  0x26   : > { %p391_p4 = pnand %p389_p2, %p375_p3  ;;  %p397_p5 = scmp.lt.s32.totalorder %s395_s27, %s388_s17 }
  0x28   : > { %p392_p12 = pneg %p391_p4  ;;  %p398_p8 = por %p397_p5, %p396_p11 }
  0x2a   : > { %p399_p9 = pnand %p398_p8, %p392_p12 }
  0x2c   : > { %402 = shalt.err (!%p399_p9)
}
  0x2d   : > { %331 = dma.hbm_to_vmem [thread:$0]  (!%p597_p13), %s591_s28, 128, %s601_s30, %s118_s4  }
  0x2e   : > { %p742_p0 = scmp.lt.s32.totalorder %s503_s12, 3  ;;  %p743_p1 = scmp.ge.s32.totalorder %s503_s12, 1 }
  0x2f   : > { %s644_s7 = scalar_lea.hbm %s733_s1, %s311_s24  ;;  %s139_s8 = scalar_lea.vmem [#allocation5], %s310_s25 }
  0x30   : > { %p635_p7 = pnand %p743_p1, %p742_p0  ;;  %s146_s14 = sshll.u32 %s139_s8, 4  ;;  %s147_s14 = int_to_ptr.vmem [resolvable:$true] %s146_s14 }
  0x31   : > { %s136_s28 = scalar_lea.sflag [#allocation6], %s582_s23  ;;  %s403_s30 = scalar_lea.hbm %s644_s7, 128 }
  0x32   : > { %s744_s29 = scalar_select %p635_p7, 1, 0 }
  0x33   : > { %p404_p11 = scmp.ne.s32.totalorder %s644_s7, %s403_s30  ;;  %s408_s24 = scalar_lea.hbm %s733_s1, 256 }
  0x34   : > { %p409_p2 = scmp.lt.u32.totalorder %s644_s7, %s733_s1  ;;  %p410_p4 = scmp.lt.u32.totalorder %s408_s24, %s403_s30 }
  0x35   : > { %p406_p12 = pnand %p404_p11, %p375_p3  ;;  %p412_p8 = scmp.lt.u32.totalorder %s403_s30, %s644_s7 }
  0x36   : > { %p411_p5 = por %p410_p4, %p409_p2 }
  0x37   : > { %p407_p10 = pneg %p406_p12 }
  0x38   : > { %p413_p9 = por %p412_p8, %p411_p5 }
  0x3a   : > { %p414_p0 = pnand %p413_p9, %p407_p10 }
  0x3c   : > { %417 = shalt.err (!%p414_p0)
}
  0x3d   : > { %s418_s23 = scalar_lea.vmem %s147_s14, 128  ;;  %s506_s25 = smov [#allocation5]  }
  0x3e   : > { %p419_p1 = scmp.ne.s32.totalorder %s147_s14, %s418_s23  ;;  %s423_s26 = sshll.u32 %s506_s25, 4  ;;  %s424_s26 = int_to_ptr.vmem [resolvable:$false] %s423_s26 }
  0x3f   : > { %s425_s27 = scalar_lea.vmem %s424_s26, 256  ;;  %p426_p6 = scmp.lt.s32.totalorder %s147_s14, %s424_s26 }
  0x40   : > { %p421_p11 = pnand %p419_p1, %p375_p3  ;;  %p427_p7 = scmp.lt.s32.totalorder %s425_s27, %s418_s23 }
  0x42   : > { %p422_p12 = pneg %p421_p11  ;;  %p428_p2 = por %p427_p7, %p426_p6 }
  0x44   : > { %p429_p4 = pnand %p428_p2, %p422_p12 }
  0x46   : > { %432 = shalt.err (!%p429_p4)
}
  0x47   : > { %334 = dma.hbm_to_vmem [thread:$0]  (!%p597_p13), %s644_s7, 128, %s147_s14, %s136_s28  }
  0x48   : > { %p745_p10 = scmp.ne.s32.totalorder %s744_s29, 0 }
  0x49   : > { %s671_s5 = sand.u32 (!%p745_p10), 1, %s495_s10   ;;  %p746_p3 = scmp.ne.s32.totalorder (!%p745_p10), %s738_s20, 0 }
  0x4a   : > { %155 = sbr.rel (%p745_p10) target bundleno = 110 (0x6e), region = 28  ;;  %s315_s6 = sshll.u32 (!%p745_p10), %s671_s5, 3 }
  0x4b   : > { %s158_s8 = scalar_lea.sflag (!%p745_p10), [#allocation3], %s671_s5  ;;  %s161_s30 = scalar_lea.vmem (!%p745_p10), [#allocation2], %s315_s6 }
  0x51   : > { %478 = dma.done.wait (%p746_p3), %s158_s8, 128  }
  0x52   : > { %480 = vsyncadd (%p746_p3), %s158_s8, 4294967168  ;;  %s167_s3 = scalar_lea.sflag [#allocation6], %s671_s5  ;;  %s170_s7 = scalar_lea.vmem [#allocation5], %s315_s6 }
  0x53   : > { %482 = dma.done.wait (%p746_p3), %s167_s3, 128  }
  0x54   : > { %484 = vsyncadd (%p746_p3), %s167_s3, 4294967168  ;;  %s195_s29 = scalar_lea.vmem [#allocation7], %s315_s6  ;;  %s319_s28 = sshll.u32 %s544_s13, 7  ;;  %v196_v0 = vld [vmem:[%s161_s30] sm:$0xff]  ;;  %v197_v1 = vld [vmem:[%s170_s7] sm:$0xff] }
  0x55   : > { %s214_s14 = sshll.u32 %s195_s29, 4  ;;  %v198_v2 = vadd.f32 %v197_v1, %v196_v0  ;;  %s690_s24 = scalar_lea.hbm %s734_s2, %s319_s28  ;;  %s685_s14 = int_to_ptr.vmem [resolvable:$true] %s214_s14 }
  0x56   : > { %s201_s20 = scalar_lea.sflag [#allocation4], %s671_s5  ;;  %s433_s17 = scalar_lea.vmem %s685_s14, 128 }
  0x57   : > { %199 = vst [vmem:[%s195_s29] sm:$0xff] %v198_v2  ;;  %p434_p6 = scmp.ne.s32.totalorder %s685_s14, %s433_s17  ;;  %p747_p13 = scmp.ne.s32.totalorder %s739_s21, 0 }
  0x58   : > { %s507_s13 = smov [#allocation7]  }
  0x59   : > { %p435_p7 = pnand %p434_p6, %p747_p13  ;;  %s437_s19 = sshll.u32 %s507_s13, 4  ;;  %s438_s19 = int_to_ptr.vmem [resolvable:$false] %s437_s19 }
  0x5a   : > { %s439_s23 = scalar_lea.vmem %s438_s19, 256  ;;  %p440_p8 = scmp.lt.s32.totalorder %s685_s14, %s438_s19 }
  0x5b   : > { %p436_p5 = pneg %p435_p7  ;;  %p441_p9 = scmp.lt.s32.totalorder %s439_s23, %s433_s17 }
  0x5d   : > { %p442_p0 = por %p441_p9, %p440_p8 }
  0x5f   : > { %p443_p1 = pnand %p442_p0, %p436_p5 }
  0x61   : > { %446 = shalt.err (!%p443_p1)
}
  0x62   : > { %s447_s25 = scalar_lea.hbm %s690_s24, 128  ;;  %s451_s5 = scalar_lea.hbm %s734_s2, 256 }
  0x63   : > { %p448_p11 = scmp.ne.s32.totalorder %s690_s24, %s447_s25  ;;  %p452_p4 = scmp.lt.u32.totalorder %s690_s24, %s734_s2 }
  0x64   : > { %p453_p10 = scmp.lt.u32.totalorder %s451_s5, %s447_s25  ;;  %p455_p6 = scmp.lt.u32.totalorder %s447_s25, %s690_s24 }
  0x65   : > { %p449_p12 = pnand %p448_p11, %p747_p13 }
  0x66   : > { %p454_p3 = por %p453_p10, %p452_p4 }
  0x67   : > { %p450_p2 = pneg %p449_p12 }
  0x68   : > { %p456_p7 = por %p455_p6, %p454_p3 }
  0x6a   : > { %p457_p5 = pnand %p456_p7, %p450_p2 }
  0x6c   : > { %460 = shalt.err (!%p457_p5)
}
  0x6d   : > { %326 = dma.vmem_to_hbm [thread:$0]  (%p747_p13), %s685_s14, 128, %s690_s24, %s201_s20  }
  0x6e PF: > { %s226_s30 = sand.u32 1, %s491_s9   ;;  %p748_p8 = scmp.ne.s32.totalorder %s740_s22, 0 }
  0x6f   : > { %p749_p9 = scmp.ge.s32.totalorder %s503_s12, 2  ;;  %s227_s3 = scalar_lea.sflag [#allocation4], %s226_s30 }
  0x71   : > { %p336_p0 = pnand %p749_p9, %p748_p8 }
  0x73   : > { %486 = dma.done.wait (!%p336_p0), %s227_s3, 128  }
  0x74   : > { %488 = vsyncadd (!%p336_p0), %s227_s3, 4294967168  ;;  %p18_p1 = scmp.ge.s32.totalorder %s548_s15, 4   ;;  %s750_s9 = smov %s495_s10 }
  0x75   : > { %s751_s10 = smov %s499_s11  ;;  %s752_s11 = smov %s560_s18 }
  0x76   : > { %s753_s12 = smov %s548_s15  ;;  %20 = sbr.rel (!%p18_p1) target bundleno = 7 (0x7), region = 86 }
  0x7d   :  { %232 = vsyncpa [#allocation3], 1 }
  0x7e   :  { %234 = vsyncpa [#allocation3 + $0x1], 1 }
  0x7f   :  { %235 = vsyncpa [#allocation6], 1 }
  0x80   :  { %237 = vsyncpa [#allocation6 + $0x1], 1 }
  0x81   :  { %238 = vsyncpa [#allocation4], 1 }
  0x82   :  { %240 = vsyncpa [#allocation4 + $0x1], 1 }

</bundles_post_ra>
